<compile_context>
chip_gen: v6e
topology: v6e:2x2x1
jax: 0.10.0
libtpu: 0.0.40
codegen_flags: <defaults>
</compile_context>

<pallas_src>
import jax
import jax.numpy as jnp
from jax.experimental import pallas as pl
from jax.experimental.pallas import tpu as pltpu

EPS = 1e-6

# Above this d_model the (D, D) all-ones MXU weight matrix stops being cheap
# in VMEM (4 MiB at D=1024); fall back to XLU cross-lane reductions.
_MXU_REDUCE_MAX_D = 1024


def _layernorm_kernel(alpha_ref, bias_ref, x_ref, o_ref):
    # x_ref: (TILE_R, D) tile in VMEM; alpha / bias: (1,) f32 scalars in SMEM.
    x = x_ref[...].astype(jnp.float32)
    d = x.shape[-1]

    if d <= _MXU_REDUCE_MAX_D:
        # Row reductions on the (otherwise idle) MXU instead of the XLU: a
        # matmul with an all-ones (D, D) matrix gives the per-row sum already
        # broadcast across all D lanes, so no (R,1)->(R,D) XLU lane broadcast
        # is needed for `x - mean` or for the final per-row scale.
        ones_dd = jnp.ones((d, d), dtype=jnp.float32)
        sum_b = jnp.dot(x, ones_dd, preferred_element_type=jnp.float32)
        mean_b = sum_b * (1.0 / d)
        diff = x - mean_b
        sq_b = jnp.dot(diff * diff, ones_dd, preferred_element_type=jnp.float32)
        # PyTorch x.std(dim=-1) is the unbiased estimator (ddof = 1).
        var_b = sq_b * (1.0 / (d - 1))
    else:
        # Very wide rows: keep the classic XLU reduction path.
        mean_b = jnp.mean(x, axis=-1, keepdims=True)
        diff = x - mean_b
        var_b = jnp.sum(diff * diff, axis=-1, keepdims=True) * (1.0 / (d - 1))

    # NOTE: eps is added to *std* (not var), matching the PyTorch reference.
    # Exact sqrt + divide (EUP slot, hidden under the DMA); the previous
    # approx reciprocal + one Newton step was not accurate enough.
    std_b = jnp.sqrt(var_b)
    inv_b = 1.0 / (std_b + EPS)

    alpha = alpha_ref[0]
    bias = bias_ref[0]
    o_ref[...] = (diff * (alpha * inv_b) + bias).astype(o_ref.dtype)


def _detect_num_tensorcores():
    """Best-effort TensorCore count (2 on v7x, 1 on v5e/v6e); defaults to 1."""
    try:
        info = pltpu.get_tpu_info()
    except Exception:
        return 1
    for name in ("num_tensorcores", "tensorcore_count", "num_cores", "core_count"):
        v = getattr(info, name, None)
        if isinstance(v, int) and 1 < v <= 8:
            return int(v)
    return 1


def _choose_tile_rows(rows, d, itemsize, row_align, target_bytes=2 << 20):
    """Row tile so one grid step moves ~target_bytes (HBM-roofline plateau).

    No minimum-step-count constraint: on single-TensorCore parts the grid is a
    serial loop, so extra steps only add ~0.35 us each.  Multi-core splitting
    is handled separately with an explicit CORE_PARALLEL grid axis.
    """
    if rows <= row_align:
        return int(rows)
    tr = max(row_align, target_bytes // max(1, d * itemsize))
    tr = min(tr, rows)
    tr = max(row_align, (tr // row_align) * row_align)
    return int(tr)


def encoder_forward(x, mask, alpha, bias, *, tile_rows=None, num_cores=None,
                    target_tile_bytes=2 << 20):
    """Encoder.forward with an empty layer stack: LayerNormalization(x).

    x:     (B, S, D) float32 or bfloat16 (D >= 2; multiple of 128 for perf)
    mask:  unused (would be consumed by the encoder layers)
    alpha: (1,) float32 scalar parameter
    bias:  (1,) float32 scalar parameter
    """
    if x is None:
        raise ValueError("Input tensor 'x' is None!")
    if x.shape[0] == 0:
        raise ValueError("Input tensor 'x' is empty!")
    del mask  # only consumed by the (empty) encoder-layer stack

    B, S, D = x.shape
    assert D >= 2, "unbiased std (ddof=1) requires d_model >= 2"
    rows = B * S
    x2d = x.reshape(rows, D)
    itemsize = x2d.dtype.itemsize

    # Sub-32-bit dtypes pack along sublanes: tile rows stay a multiple of
    # 8 * (4 / itemsize)  (8 for f32, 16 for bf16).
    row_align = 8 * max(1, 4 // itemsize)
    if tile_rows is None:
        tile_rows = _choose_tile_rows(rows, D, itemsize, row_align,
                                      target_tile_bytes)
    if num_cores is None:
        num_cores = _detect_num_tensorcores()

    steps_total = pl.cdiv(rows, tile_rows)
    if num_cores > 1:
        # Explicit TensorCore split ("parallel" semantics is a codegen no-op).
        # Shrink the tile until the step count divides evenly so no index_map
        # ever points at a fully out-of-bounds block.
        tr = tile_rows
        while tr > row_align and pl.cdiv(rows, tr) % num_cores != 0:
            tr -= row_align
        if pl.cdiv(rows, tr) % num_cores == 0:
            tile_rows = tr
            steps_total = pl.cdiv(rows, tr)
        else:
            num_cores = 1

    if num_cores > 1:
        steps_per_core = steps_total // num_cores
        grid = (num_cores, steps_per_core)
        row_map = lambda c, i: (c * steps_per_core + i, 0)
        dim_sem = (pltpu.CORE_PARALLEL, pltpu.ARBITRARY)
    else:
        grid = (steps_total,)
        row_map = lambda i: (i, 0)
        dim_sem = (pltpu.ARBITRARY,)

    # Explicit VMEM budget: 2-in + 2-out pipeline buffers, ~6 full-tile f32
    # temporaries in the body, the (D, D) ones weights, plus slack.  Stays
    # well under physical VMEM on every generation (incl. v7x's 64 MiB/TC).
    tile_in_bytes = tile_rows * D * itemsize
    ones_bytes = D * D * 4 if D <= _MXU_REDUCE_MAX_D else 0
    vmem_limit = int(4 * tile_in_bytes + 6 * tile_rows * D * 4
                     + ones_bytes + (4 << 20))
    vmem_limit = min(vmem_limit, 96 << 20)

    # Mem-bound custom call: tell XLA roughly what it costs.
    if D <= _MXU_REDUCE_MAX_D:
        flops = 4 * rows * D * D + 6 * rows * D
        transcendentals = 2 * rows * D
    else:
        flops = 8 * rows * D
        transcendentals = 2 * rows
    cost = pl.CostEstimate(
        flops=flops,
        transcendentals=transcendentals,
        bytes_accessed=2 * rows * D * itemsize,
    )

    out = pl.pallas_call(
        _layernorm_kernel,
        out_shape=jax.ShapeDtypeStruct((rows, D), x.dtype),
        grid_spec=pltpu.PrefetchScalarGridSpec(
            num_scalar_prefetch=0,
            grid=grid,
            in_specs=[
                pl.BlockSpec(memory_space=pltpu.MemorySpace.SMEM),  # alpha
                pl.BlockSpec(memory_space=pltpu.MemorySpace.SMEM),  # bias
                pl.BlockSpec((tile_rows, D), row_map),              # x tile
            ],
            out_specs=pl.BlockSpec((tile_rows, D), row_map),
        ),
        compiler_params=pltpu.CompilerParams(
            dimension_semantics=dim_sem,
            vmem_limit_bytes=vmem_limit,
        ),
        cost_estimate=cost,
    )(alpha, bias, x2d)

    return out.reshape(B, S, D)


def _reference(x, alpha, bias):
    x = x.astype(jnp.float32)
    mean = jnp.mean(x, axis=-1, keepdims=True)
    var = jnp.sum((x - mean) ** 2, axis=-1, keepdims=True) / (x.shape[-1] - 1)
    std = jnp.sqrt(var)
    return alpha[0] * (x - mean) / (std + EPS) + bias[0]


if __name__ == "__main__":
    key = jax.random.PRNGKey(0)

    # Deterministic parameter init matching nn.Parameter(torch.ones(1)).
    alpha = jnp.ones((1,), dtype=jnp.float32)
    bias = jnp.ones((1,), dtype=jnp.float32)

    # Small but representative transformer shape (lane-dense d_model = 128).
    B, S, D = 2, 8, 128
    k1, k2, k3 = jax.random.split(key, 3)
    x = jax.random.normal(k1, (B, S, D), dtype=jnp.float32)
    mask = jnp.ones((B, 1, 1, S), dtype=jnp.float32)  # placeholder attention mask

    out = jax.block_until_ready(encoder_forward(x, mask, alpha, bias))
    ref = _reference(x, alpha, bias)
    assert out.shape == (B, S, D)
    assert jnp.allclose(out, ref, atol=1e-4, rtol=1e-4), "mismatch vs reference"

    # Exercise the pl.cdiv (non-divisible rows -> partial last tile) path.
    B2, S2 = 3, 5
    x2 = jax.random.normal(k2, (B2, S2, D), dtype=jnp.float32)
    mask2 = jnp.ones((B2, 1, 1, S2), dtype=jnp.float32)
    out2 = jax.block_until_ready(encoder_forward(x2, mask2, alpha, bias))
    ref2 = _reference(x2, alpha, bias)
    assert out2.shape == (B2, S2, D)
    assert jnp.allclose(out2, ref2, atol=1e-4, rtol=1e-4), "mismatch (ragged grid)"

    # bf16 I/O (halves the bytes moved for this HBM-bound kernel); f32
    # accumulation happens inside the kernel.
    xb = jax.random.normal(k3, (B, S, D), dtype=jnp.float32).astype(jnp.bfloat16)
    outb = jax.block_until_ready(encoder_forward(xb, mask, alpha, bias))
    refb = _reference(xb, alpha, bias)
    assert outb.dtype == jnp.bfloat16
    assert jnp.allclose(outb.astype(jnp.float32), refb, atol=3e-2, rtol=3e-2), \
        "mismatch (bf16 I/O)"

    print("KERNEL_OK")
</pallas_src>

<mosaic_0001>
module attributes {stable_mosaic.version = 11 : i64} {
  func.func @_layernorm_kernel(%arg0: i32, %arg1: memref<1xf32, #tpu.memory_space<smem>>, %arg2: memref<1xf32, #tpu.memory_space<smem>>, %arg3: memref<16x128xf32, #tpu.memory_space<vmem>>, %arg4: memref<16x128xf32, #tpu.memory_space<vmem>>) attributes {dimension_semantics = [#tpu.dimension_semantics<arbitrary>], iteration_bounds = array<i64: 1>, scalar_prefetch = 0 : i64, scratch_operands = 0 : i64, tpu.core_type = #tpu.core_type<tc>, window_params = [{transform_indices = @transform_0, window_bounds = array<i64: 1>}, {transform_indices = @transform_1, window_bounds = array<i64: 1>}, {transform_indices = @transform_2, window_bounds = array<i64: 16, 128>}, {transform_indices = @transform_3, window_bounds = array<i64: 16, 128>}]} {
    %c0 = arith.constant 0 : index
    %c0_0 = arith.constant 0 : index
    %0 = vector.load %arg3[%c0, %c0_0] : memref<16x128xf32, #tpu.memory_space<vmem>>, vector<16x128xf32>
    %cst = arith.constant 1.000000e+00 : f32
    %1 = vector.broadcast %cst : f32 to vector<128x128xf32>
    %cst_1 = arith.constant dense<0.000000e+00> : vector<16x128xf32>
    %2 = tpu.matmul %0, %1, %cst_1 {dimension_numbers = #tpu.dot_dimension_numbers<[1], [0], [0], [1], [0, 0, 1, 1], [], []>} : vector<16x128xf32>, vector<128x128xf32>, vector<16x128xf32> -> vector<16x128xf32>
    %cst_2 = arith.constant 7.812500e-03 : f32
    %3 = vector.broadcast %cst_2 : f32 to vector<16x128xf32>
    %4 = arith.mulf %2, %3 : vector<16x128xf32>
    %5 = arith.subf %0, %4 : vector<16x128xf32>
    %6 = arith.mulf %5, %5 : vector<16x128xf32>
    %cst_3 = arith.constant dense<0.000000e+00> : vector<16x128xf32>
    %7 = tpu.matmul %6, %1, %cst_3 {dimension_numbers = #tpu.dot_dimension_numbers<[1], [0], [0], [1], [0, 0, 1, 1], [], []>} : vector<16x128xf32>, vector<128x128xf32>, vector<16x128xf32> -> vector<16x128xf32>
    %cst_4 = arith.constant 0.00787401571 : f32
    %8 = vector.broadcast %cst_4 : f32 to vector<16x128xf32>
    %9 = arith.mulf %7, %8 : vector<16x128xf32>
    %10 = math.sqrt %9 : vector<16x128xf32>
    %cst_5 = arith.constant 9.99999997E-7 : f32
    %11 = vector.broadcast %cst_5 : f32 to vector<16x128xf32>
    %12 = arith.addf %10, %11 : vector<16x128xf32>
    %cst_6 = arith.constant 1.000000e+00 : f32
    %13 = vector.broadcast %cst_6 : f32 to vector<16x128xf32>
    %14 = arith.divf %13, %12 : vector<16x128xf32>
    %c0_7 = arith.constant 0 : index
    %15 = memref.load %arg1[%c0_7] : memref<1xf32, #tpu.memory_space<smem>>
    %c0_8 = arith.constant 0 : index
    %16 = memref.load %arg2[%c0_8] : memref<1xf32, #tpu.memory_space<smem>>
    %17 = vector.broadcast %15 : f32 to vector<16x128xf32>
    %18 = arith.mulf %17, %14 : vector<16x128xf32>
    %19 = arith.mulf %5, %18 : vector<16x128xf32>
    %20 = vector.broadcast %16 : f32 to vector<16x128xf32>
    %21 = arith.addf %19, %20 : vector<16x128xf32>
    %c0_9 = arith.constant 0 : index
    %c0_10 = arith.constant 0 : index
    %22 = vector.load %arg4[%c0_9, %c0_10] : memref<16x128xf32, #tpu.memory_space<vmem>>, vector<16x128xf32>
    tpu.vector_store %arg4[%c0_9, %c0_10], %21 {strides = array<i32>} : memref<16x128xf32, #tpu.memory_space<vmem>>, vector<16x128xf32>,
    return
  }
  func.func @transform_0(%arg0: i32) -> i32 {
    %c0_i32 = arith.constant 0 : i32
    %c0_i32_0 = arith.constant 0 : i32
    return %c0_i32 : i32
  }
  func.func @transform_1(%arg0: i32) -> i32 {
    %c0_i32 = arith.constant 0 : i32
    %c0_i32_0 = arith.constant 0 : i32
    return %c0_i32 : i32
  }
  func.func @transform_2(%arg0: i32) -> (i32, i32) {
    %c0_i32 = arith.constant 0 : i32
    %c0_i32_0 = arith.constant 0 : i32
    return %arg0, %c0_i32 : i32, i32
  }
  func.func @transform_3(%arg0: i32) -> (i32, i32) {
    %c0_i32 = arith.constant 0 : i32
    %c0_i32_0 = arith.constant 0 : i32
    return %arg0, %c0_i32 : i32, i32
  }
}

</mosaic_0001>

<bundles_post_ra>
// kernel: tpu_custom_call.1
= control target key start
LH: loop header
LB: loop body
LE: loop exit
PB: predicated region body
PF: predicated region fallthrough
CT: control target
= control target key end

     0   :  { %10 = vsyncpa [#allocation5], 0  ;;  %s510_s0 = inlined_call_operand.<no memory space> [shape: f32[1], index: 0, kind: input, shape index: {}]   ;;  %s511_s1 = inlined_call_operand.<no memory space> [shape: f32[1], index: 1, kind: input, shape index: {}]   ;;  %s512_s2 = inlined_call_operand.hbm [shape: f32[16,128], index: 2, kind: input, shape index: {}]   ;;  %s513_s3 = inlined_call_operand.hbm [shape: f32[16,128], index: 3, kind: output, shape index: {}]  }
   0x1   :  { %11 = vsyncpa [#allocation6], 0  ;;  %s403_s12 = smov [#allocation4]  }
   0x2   :  { %s21_s13 = sshll.u32 %s403_s12, 4  ;;  %s22_s13 = int_to_ptr.vmem [resolvable:$true] %s21_s13 }
   0x3   :  { %s367_s14 = scalar_lea.vmem %s22_s13, 256  ;;  %p372_p1 = scmp.lt.s32.totalorder %s22_s13, %s22_s13 }
   0x4   :  { %p368_p0 = scmp.ne.s32.totalorder %s22_s13, %s367_s14  ;;  %p373_p2 = scmp.lt.s32.totalorder %s367_s14, %s367_s14 }
   0x6   :  { %p374_p3 = por %p373_p2, %p372_p1 }
   0x8   :  { %p375_p4 = pnand %p374_p3, %p368_p0 }
   0xa   :  { %378 = shalt.err (!%p375_p4)
}
   0xb   :  { %s404_s15 = smov 128   ;;  %s405_s16 = smov 8  }
   0xc   :  { %27 = dma.hbm_to_vmem [thread:$0]  %s512_s2, 256, %s22_s13, [#allocation5], %s404_s15, %s404_s15, %s405_s16  }
   0xd   :  { %399 = dma.done.wait [#allocation5], 256  }
   0xe   :  { %400 = vsyncadd [#allocation5], 4294967040  ;;  %v406_v0 = vmov 1.0   ;;  %v31_v1 = vld [vmem:[#allocation4] sm:$0xff]  ;;  %v32_v2 = vld [vmem:[#allocation4 + $0x8] sm:$0xff]  ;;  %v213_v27 = vstv %s510_s0  ;;  %v218_v30 = vstv %s511_s1  ;;  %s407_s22 = smov [#allocation7]  }
   0xf   :  { %276 = vmatprep.subr.mxu0 %v406_v0  ;;  %311 = vmatprep.subr.mxu1 %v406_v0  ;;  %s228_s23 = sshll.u32 %s407_s22, 4  ;;  %s229_s23 = int_to_ptr.vmem [resolvable:$true] %s228_s23 }
  0x10   :  { %277 = vmatpush3.msra.mxu0 %v406_v0  ;;  %312 = vmatpush3.msra.mxu1 %v406_v0  ;;  %s379_s24 = scalar_lea.vmem %s229_s23, 256  ;;  %p384_p6 = scmp.lt.s32.totalorder %s229_s23, %s229_s23 }
  0x11   :  { %278 = vmatprep.subr.mxu0 %v406_v0  ;;  %313 = vmatprep.subr.mxu1 %v406_v0  ;;  %p380_p5 = scmp.ne.s32.totalorder %s229_s23, %s379_s24  ;;  %p385_p7 = scmp.lt.s32.totalorder %s379_s24, %s379_s24 }
  0x12   :  { %279 = vmatpush3.msra.mxu0 %v406_v0  ;;  %314 = vmatpush3.msra.mxu1 %v406_v0 }
  0x13   :  { %280 = vmatprep.subr.mxu0 %v406_v0  ;;  %315 = vmatprep.subr.mxu1 %v406_v0  ;;  %p386_p8 = por %p385_p7, %p384_p6 }
  0x14   :  { %281 = vmatpush3.msra.mxu0 %v406_v0  ;;  %316 = vmatpush3.msra.mxu1 %v406_v0 }
  0x15   :  { %282 = vmatprep.subr.mxu0 %v406_v0  ;;  %317 = vmatprep.subr.mxu1 %v406_v0  ;;  %p387_p9 = pnand %p386_p8, %p380_p5 }
  0x16   :  { %283 = vmatpush3.msra.mxu0 %v406_v0  ;;  %308 = vmatprep.mubr.f32.mxu0 %v31_v1 }
  0x17   :  { %284 = vmatprep.subr.mxu0 %v406_v0  ;;  %318 = vmatpush3.msra.mxu1 %v406_v0 }
  0x18   :  { %285 = vmatpush3.msra.mxu0 %v406_v0  ;;  %319 = vmatprep.subr.mxu1 %v406_v0 }
  0x19   :  { %286 = vmatprep.subr.mxu0 %v406_v0  ;;  %320 = vmatpush3.msra.mxu1 %v406_v0 }
  0x1a   :  { %287 = vmatpush3.msra.mxu0 %v406_v0  ;;  %321 = vmatprep.subr.mxu1 %v406_v0 }
  0x1b   :  { %288 = vmatprep.subr.mxu0 %v406_v0  ;;  %322 = vmatpush3.msra.mxu1 %v406_v0 }
  0x1c   :  { %289 = vmatpush3.msra.mxu0 %v406_v0  ;;  %323 = vmatprep.subr.mxu1 %v406_v0 }
  0x1d   :  { %290 = vmatprep.subr.mxu0 %v406_v0  ;;  %324 = vmatpush3.msra.mxu1 %v406_v0 }
  0x1e   :  { %291 = vmatpush3.msra.mxu0 %v406_v0  ;;  %325 = vmatprep.subr.mxu1 %v406_v0 }
  0x1f   :  { %292 = vmatprep.subr.mxu0 %v406_v0  ;;  %326 = vmatpush3.msra.mxu1 %v406_v0 }
  0x20   :  { %293 = vmatpush3.msra.mxu0 %v406_v0  ;;  %327 = vmatprep.subr.mxu1 %v406_v0 }
  0x21   :  { %294 = vmatprep.subr.mxu0 %v406_v0  ;;  %328 = vmatpush3.msra.mxu1 %v406_v0 }
  0x22   :  { %295 = vmatpush3.msra.mxu0 %v406_v0  ;;  %329 = vmatprep.subr.mxu1 %v406_v0 }
  0x23   :  { %296 = vmatprep.subr.mxu0 %v406_v0  ;;  %330 = vmatpush3.msra.mxu1 %v406_v0 }
  0x24   :  { %297 = vmatpush3.msra.mxu0 %v406_v0  ;;  %331 = vmatprep.subr.mxu1 %v406_v0 }
  0x25   :  { %298 = vmatprep.subr.mxu0 %v406_v0  ;;  %332 = vmatpush3.msra.mxu1 %v406_v0 }
  0x26   :  { %299 = vmatpush3.msra.mxu0 %v406_v0  ;;  %333 = vmatprep.subr.mxu1 %v406_v0 }
  0x27   :  { %300 = vmatprep.subr.mxu0 %v406_v0  ;;  %334 = vmatpush3.msra.mxu1 %v406_v0 }
  0x28   :  { %301 = vmatpush3.msra.mxu0 %v406_v0  ;;  %335 = vmatprep.subr.mxu1 %v406_v0 }
  0x29   :  { %302 = vmatprep.subr.mxu0 %v406_v0  ;;  %336 = vmatpush3.msra.mxu1 %v406_v0 }
  0x2a   :  { %303 = vmatpush3.msra.mxu0 %v406_v0  ;;  %337 = vmatprep.subr.mxu1 %v406_v0 }
  0x2b   :  { %304 = vmatprep.subr.mxu0 %v406_v0  ;;  %338 = vmatpush3.msra.mxu1 %v406_v0 }
  0x2c   :  { %305 = vmatpush3.msra.mxu0 %v406_v0  ;;  %339 = vmatprep.subr.mxu1 %v406_v0 }
  0x2d   :  { %306 = vmatprep.subr.mxu0 %v406_v0  ;;  %340 = vmatpush3.msra.mxu1 %v406_v0 }
  0x2e   :  { %307 = vmatpush3.msra.mxu0 %v406_v0  ;;  %341 = vmatprep.subr.mxu1 %v406_v0 }
  0x2f   :  { %309 = vmatmul.mubr.f32.vlgmr.msra.gmra.mxu0 %v32_v2  ;;  %342 = vmatpush3.msra.mxu1 %v406_v0 }
  0xef   :  { %v310_v3 = vpop.f32.mrf.mxu0 }
  0xf0   :  { %v109_v4 = vmul.f32 0.0078125, %v310_v3 }
  0xf1   :  { %v99_v5 = vpop.f32.mrf.mxu0 }
  0xf2   :  { %v108_v6 = vmul.f32 0.0078125, %v99_v5  ;;  %v111_v7 = vsub.f32 %v32_v2, %v109_v4 }
  0xf4   :  { %v110_v8 = vsub.f32 %v31_v1, %v108_v6  ;;  %v113_v10 = vmul.f32 %v111_v7, %v111_v7 }
  0xf6   :  { %v112_v9 = vmul.f32 %v110_v8, %v110_v8 }
  0xf8   :  { %343 = vmatprep.mubr.f32.mxu1 %v112_v9 }
  0xf9   :  { %344 = vmatmul.mubr.f32.vlgmr.msra.gmra.mxu1 %v113_v10 }
 0x1b9   :  { %v345_v11 = vpop.f32.mrf.mxu1 }
 0x1ba   :  { %v190_v12 = vmul.f32 0.007874016, %v345_v11 }
 0x1bb   :  { %v180_v13 = vpop.f32.mrf.mxu1 }
 0x1bc   :  { %351 = vrsqrt.f32 %v190_v12  ;;  %v189_v14 = vmul.f32 0.007874016, %v180_v13  ;;  %vm200_vm0 = vcmp.eq.f32.partialorder %v190_v12, inf  ;;  %v203_v17 = vand.u32 2147483648, %v190_v12 }
 0x1bd   :  { %vm202_vm1 = vcmp.eq.f32.partialorder %v190_v12, 0.0 }
 0x1be   :  { %353 = vrsqrt.f32 %v189_v14  ;;  %vm193_vm2 = vcmp.eq.f32.partialorder %v189_v14, inf  ;;  %v196_v23 = vand.u32 2147483648, %v189_v14  ;;  %vm195_vm3 = vcmp.eq.f32.partialorder %v189_v14, 0.0 }
 0x1c9   :  { %v352_v15 = vpop.eup %351 }
 0x1ca   :  { %v199_v16 = vmul.f32 %v352_v15, %v190_v12 }
 0x1cb   :  { %v354_v18 = vpop.eup %353 }
 0x1cc   :  { %v201_v19 = vsel %vm200_vm0, %v190_v12, %v199_v16  ;;  %v192_v21 = vmul.f32 %v354_v18, %v189_v14 }
 0x1cd   :  { %v204_v20 = vsel %vm202_vm1, %v203_v17, %v201_v19 }
 0x1ce   :  { %v206_v22 = vadd.f32 1e-06, %v204_v20  ;;  %v194_v24 = vsel %vm193_vm2, %v189_v14, %v192_v21 }
 0x1cf   :  { %v197_v25 = vsel %vm195_vm3, %v196_v23, %v194_v24 }
 0x1d0   :  { %355 = vrcp.f32 %v206_v22  ;;  %v205_v26 = vadd.f32 1e-06, %v197_v25 }
 0x1d2   :  { %357 = vrcp.f32 %v205_v26 }
 0x1dd   :  { %v356_v28 = vpop.eup %355 }
 0x1de   :  { %v215_v29 = vmul.f32 %v356_v28, %v213_v27 }
 0x1df   :  { %v358_v31 = vpop.eup %357 }
 0x1e0   :  { %v217_v32 = vmul.f32 %v215_v29, %v111_v7  ;;  %v214_v33 = vmul.f32 %v358_v31, %v213_v27 }
 0x1e2   :  { %v220_v34 = vadd.f32 %v218_v30, %v217_v32  ;;  %v216_v35 = vmul.f32 %v214_v33, %v110_v8 }
 0x1e4   :  { %222 = vst [vmem:[#allocation7 + $0x8] sm:$0xff] %v220_v34  ;;  %v219_v36 = vadd.f32 %v218_v30, %v216_v35 }
 0x1e6   :  { %221 = vst [vmem:[#allocation7] sm:$0xff] %v219_v36 }
 0x1e7   :  { %390 = shalt.err (!%p387_p9)
}
 0x1e8   :  { %234 = dma.vmem_to_hbm [thread:$0]  %s229_s23, 256, %s513_s3, [#allocation6], %s404_s15, %s404_s15, %s405_s16  }
 0x1e9   :  { %401 = dma.done.wait [#allocation6], 256  }
 0x1ea   :  { %402 = vsyncadd [#allocation6], 4294967040 }
 0x1eb   :  { %238 = vsyncpa [#allocation5], 1 }
 0x1ec   :  { %239 = vsyncpa [#allocation6], 1 }

</bundles_post_ra>
